<compile_context>
chip_gen: v7x
topology: tpu7x:2x2x1
jax: 0.10.0
libtpu: 0.0.40
codegen_flags: <defaults>
</compile_context>

<pallas_src>
import functools

import jax
import jax.numpy as jnp
import numpy as np
from jax import lax
from jax.experimental import pallas as pl
from jax.experimental.pallas import tpu as pltpu


_MAX_PIXEL_TILE = 16384


# ----------------------------------------------------------------------------
# Generation-aware budgets & tiling plan
# ----------------------------------------------------------------------------
def _vmem_budgets():
    """(per-step tile budget bytes, scoped VMEM limit bytes) for this chip."""
    cap = None
    try:
        cap = getattr(pltpu.get_tpu_info(), "vmem_capacity_bytes", None)
    except Exception:
        cap = None
    if not cap:
        cap = 64 << 20                       # conservative: v7x per-TC VMEM
    if cap >= (96 << 20):                    # v5e / v6e: 128 MiB VMEM
        return 48 << 20, 96 << 20
    return 20 << 20, 48 << 20                # v7x: 64 MiB per TensorCore


def _plan_pixel_tile(p, per_pixel_bytes, budget_bytes, max_tile):
    """Pixel tile: the full extent if it fits, else the largest 128-multiple
    under the VMEM budget.  The grid is cdiv(P, tile) and the final partial
    tile is masked in-kernel (never padded with an HBM copy)."""
    cap = budget_bytes // max(per_pixel_bytes, 1)
    cap = max(128, min(max_tile, (cap // 128) * 128))
    if p <= cap:
        return p          # single full-extent block (exempt from 128 rule)
    return cap


# ----------------------------------------------------------------------------
# In-kernel helpers
# ----------------------------------------------------------------------------
def _ce_sum(logits, onehot, col_w):
    """Sum over pixels of softmax cross-entropy.
    logits: (C, tP) f32 class-major; onehot: (C, tP) bool; col_w: (1, tP) f32
    column weight or None (all columns valid)."""
    m = jnp.max(logits, axis=0, keepdims=True)                          # (1,tP)
    lse = m + jnp.log(jnp.sum(jnp.exp(logits - m), axis=0, keepdims=True))
    picked = jnp.sum(jnp.where(onehot, logits, 0.0), axis=0, keepdims=True)
    per_px = lse - picked
    if col_w is not None:
        per_px = per_px * col_w
    return jnp.sum(per_px)


def _sum_sq_cols_f32(x, chunk=256):
    """Per-column sum of squares with f32 accumulation, chunked over rows so a
    narrow-dtype (D, tP) tile never gets a full (D, tP) f32 copy in VMEM."""
    d = x.shape[0]
    if x.dtype == jnp.float32 or d <= chunk:
        xf = x.astype(jnp.float32)
        return jnp.sum(xf * xf, axis=0, keepdims=True)
    acc = None
    for s in range(0, d, chunk):
        c = x[s:min(s + chunk, d)].astype(jnp.float32)
        part = jnp.sum(c * c, axis=0, keepdims=True)
        acc = part if acc is None else acc + part
    return acc


def _tail_mask(p_id, tile, n_pix):
    """Column-validity mask for the (possibly partial) running pixel tile."""
    base = p_id * tile
    col = lax.broadcasted_iota(jnp.int32, (1, tile), 1) + base
    valid = col < n_pix
    return valid, valid.astype(jnp.float32)


# ----------------------------------------------------------------------------
# Kernels
# ----------------------------------------------------------------------------
def _fused_seg_clip_kernel(logits_ref, feat_ref, text_ref, labels_ref,
                           seg_out_ref, clip_out_ref, *,
                           n_pix, tile, accumulate, mm_dtype):
    p = pl.program_id(1)
    labels = labels_ref[0]                                   # (1, tP) i32
    logits = logits_ref[0].astype(jnp.float32)               # (C, tP)
    c = logits.shape[0]

    needs_mask = (n_pix % tile) != 0                         # static
    if needs_mask:
        col_valid, col_w = _tail_mask(p, tile, n_pix)
        logits = jnp.where(col_valid, logits, 0.0)           # keep tail NaN-free
    else:
        col_valid, col_w = None, None

    # One-hot built once per tile; shared with the CLIP CE when K == C.
    onehot = lax.broadcasted_iota(jnp.int32, logits.shape, 0) == labels
    seg_sum = _ce_sum(logits, onehot, col_w)

    # CLIP logits: (K, D) @ (D, tP) on the MXU at native precision.  The
    # per-pixel L2 norm becomes a post-matmul rsqrt column scale (text rows
    # were normalized once in the wrapper).
    feat = feat_ref[0]                                       # (D, tP)
    text_n = text_ref[...]                                   # (K, D)
    if mm_dtype is not None:                                 # e.g. bf16 on v5e
        text_n = text_n.astype(mm_dtype)
        feat_mm = feat.astype(mm_dtype)
    else:
        feat_mm = feat
    raw = lax.dot_general(text_n, feat_mm, (((1,), (0,)), ((), ())),
                          preferred_element_type=jnp.float32)     # (K, tP)
    inv_norm = lax.rsqrt(jnp.maximum(_sum_sq_cols_f32(feat), 1e-24))
    clip_logits = raw * inv_norm
    if needs_mask:
        clip_logits = jnp.where(col_valid, clip_logits, 0.0)
    k = clip_logits.shape[0]
    clip_onehot = onehot if k == c else (
        lax.broadcasted_iota(jnp.int32, clip_logits.shape, 0) == labels)
    clip_sum = _ce_sum(clip_logits, clip_onehot, col_w)

    if accumulate:
        @pl.when(p == 0)
        def _():
            seg_out_ref[...] = jnp.zeros_like(seg_out_ref)
            clip_out_ref[...] = jnp.zeros_like(clip_out_ref)
        seg_out_ref[...] += jnp.broadcast_to(seg_sum, seg_out_ref.shape)
        clip_out_ref[...] += jnp.broadcast_to(clip_sum, clip_out_ref.shape)
    else:
        seg_out_ref[...] = jnp.broadcast_to(seg_sum, seg_out_ref.shape)
        clip_out_ref[...] = jnp.broadcast_to(clip_sum, clip_out_ref.shape)


def _class_major_ce_kernel(logits_ref, labels_ref, out_ref, *,
                           n_pix, tile, accumulate):
    p = pl.program_id(1)
    labels = labels_ref[0]                                   # (1, tP) i32
    logits = logits_ref[0].astype(jnp.float32)               # (C, tP)
    needs_mask = (n_pix % tile) != 0
    if needs_mask:
        col_valid, col_w = _tail_mask(p, tile, n_pix)
        logits = jnp.where(col_valid, logits, 0.0)
    else:
        col_w = None
    onehot = lax.broadcasted_iota(jnp.int32, logits.shape, 0) == labels
    s = _ce_sum(logits, onehot, col_w)
    if accumulate:
        @pl.when(p == 0)
        def _():
            out_ref[...] = jnp.zeros_like(out_ref)
        out_ref[...] += jnp.broadcast_to(s, out_ref.shape)
    else:
        out_ref[...] = jnp.broadcast_to(s, out_ref.shape)


# ----------------------------------------------------------------------------
# pallas_call wrappers
# ----------------------------------------------------------------------------
def _fused_seg_clip_mean(seg_logits, seg_feat, seg_gt, text_embeds, *,
                         mm_dtype=None, max_pixel_tile=_MAX_PIXEL_TILE,
                         tile_budget_bytes=None):
    B, C, H, W = seg_logits.shape
    D = seg_feat.shape[1]
    K = text_embeds.shape[0]
    P = H * W

    budget, vmem_limit = _vmem_budgets()
    if tile_budget_bytes is not None:
        budget = tile_budget_bytes

    logits_r = seg_logits.reshape(B, C, P)       # free reshapes (no copy)
    feat_r = seg_feat.reshape(B, D, P)
    labels_r = seg_gt.reshape(B, 1, P).astype(jnp.int32)

    # Hoisted text normalization (once, f32), then back to the feature dtype
    # so the in-kernel MXU matmul sees native-precision operands.
    text32 = text_embeds.astype(jnp.float32)
    text_n = (text32 * lax.rsqrt(jnp.maximum(
        jnp.sum(text32 * text32, axis=-1, keepdims=True), 1e-24))
              ).astype(seg_feat.dtype)

    l_isz = jnp.dtype(seg_logits.dtype).itemsize
    f_isz = jnp.dtype(seg_feat.dtype).itemsize
    # double-buffered input streams + f32 in-kernel intermediates per pixel
    per_pixel = (2 * (C * l_isz + D * f_isz + 4)
                 + 4 * (2 * C + 2 * K + min(D, 256) + 8))
    tP = _plan_pixel_tile(P, per_pixel, budget, max_pixel_tile)
    nP = (P + tP - 1) // tP

    # B == 1: per-tile partial sums over a fully 'parallel' grid (keeps both
    # v7x TensorCores busy).  Otherwise accumulate over an 'arbitrary' pixel
    # axis into the resident output blocks (output traffic = B blocks).
    accumulate = not (B == 1 and nP > 1)

    kernel = functools.partial(_fused_seg_clip_kernel, n_pix=P, tile=tP,
                               accumulate=accumulate, mm_dtype=mm_dtype)
    if accumulate:
        out_shape = (jax.ShapeDtypeStruct((B, 1, 1), jnp.float32),
                     jax.ShapeDtypeStruct((B, 1, 1), jnp.float32))
        out_specs = (pl.BlockSpec((1, 1, 1), lambda b, p: (b, 0, 0)),
                     pl.BlockSpec((1, 1, 1), lambda b, p: (b, 0, 0)))
        dim_sem = ("parallel", "arbitrary")
    else:
        out_shape = (jax.ShapeDtypeStruct((B, nP, 1, 1), jnp.float32),
                     jax.ShapeDtypeStruct((B, nP, 1, 1), jnp.float32))
        out_specs = (pl.BlockSpec((1, 1, 1, 1), lambda b, p: (b, p, 0, 0)),
                     pl.BlockSpec((1, 1, 1, 1), lambda b, p: (b, p, 0, 0)))
        dim_sem = ("parallel", "parallel")

    cost = pl.CostEstimate(
        flops=int(B * P * (2 * D * K + 3 * D + 8 * (C + K))),
        transcendentals=int(B * P * (C + K + 1)),
        bytes_accessed=int(B * P * (C * l_isz + D * f_isz + 4)
                           + K * D * f_isz + 8 * B * nP))

    seg_part, clip_part = pl.pallas_call(
        kernel,
        out_shape=out_shape,
        grid_spec=pltpu.PrefetchScalarGridSpec(
            num_scalar_prefetch=0,
            grid=(B, nP),
            in_specs=[
                pl.BlockSpec((1, C, tP), lambda b, p: (b, 0, p)),
                pl.BlockSpec((1, D, tP), lambda b, p: (b, 0, p)),
                pl.BlockSpec((K, D), lambda b, p: (0, 0)),
                pl.BlockSpec((1, 1, tP), lambda b, p: (b, 0, p)),
            ],
            out_specs=out_specs,
        ),
        compiler_params=pltpu.CompilerParams(
            dimension_semantics=dim_sem,
            vmem_limit_bytes=vmem_limit),
        cost_estimate=cost,
    )(logits_r, feat_r, text_n, labels_r)

    denom = jnp.float32(B * P)
    return jnp.sum(seg_part) / denom, jnp.sum(clip_part) / denom


def _class_major_ce_mean(logits_nchw, labels_nhw, *,
                         max_pixel_tile=_MAX_PIXEL_TILE,
                         tile_budget_bytes=None):
    """Mean pixel-wise CE for NCHW logits vs. int labels (no transposes)."""
    N, C, H, W = logits_nchw.shape
    P = H * W
    budget, vmem_limit = _vmem_budgets()
    if tile_budget_bytes is not None:
        budget = tile_budget_bytes

    logits_r = logits_nchw.reshape(N, C, P)
    labels_r = labels_nhw.reshape(N, 1, P).astype(jnp.int32)

    isz = jnp.dtype(logits_nchw.dtype).itemsize
    per_pixel = 2 * (C * isz + 4) + 4 * (2 * C + 8)
    tP = _plan_pixel_tile(P, per_pixel, budget, max_pixel_tile)
    nP = (P + tP - 1) // tP
    accumulate = not (N == 1 and nP > 1)

    kernel = functools.partial(_class_major_ce_kernel, n_pix=P, tile=tP,
                               accumulate=accumulate)
    if accumulate:
        out_shape = jax.ShapeDtypeStruct((N, 1, 1), jnp.float32)
        out_spec = pl.BlockSpec((1, 1, 1), lambda n, p: (n, 0, 0))
        dim_sem = ("parallel", "arbitrary")
    else:
        out_shape = jax.ShapeDtypeStruct((N, nP, 1, 1), jnp.float32)
        out_spec = pl.BlockSpec((1, 1, 1, 1), lambda n, p: (n, p, 0, 0))
        dim_sem = ("parallel", "parallel")

    cost = pl.CostEstimate(
        flops=int(8 * N * P * C),
        transcendentals=int(N * P * (C + 1)),
        bytes_accessed=int(N * P * (C * isz + 4) + 4 * N * nP))

    partial_sums = pl.pallas_call(
        kernel,
        out_shape=out_shape,
        grid_spec=pltpu.PrefetchScalarGridSpec(
            num_scalar_prefetch=0,
            grid=(N, nP),
            in_specs=[
                pl.BlockSpec((1, C, tP), lambda n, p: (n, 0, p)),
                pl.BlockSpec((1, 1, tP), lambda n, p: (n, 0, p)),
            ],
            out_specs=out_spec,
        ),
        compiler_params=pltpu.CompilerParams(
            dimension_semantics=dim_sem,
            vmem_limit_bytes=vmem_limit),
        cost_estimate=cost,
    )(logits_r, labels_r)
    return jnp.sum(partial_sums) / jnp.float32(N * P)


def _row_ce_mean(logits, labels):
    """Mean CE over a tiny (N_roi, K) similarity matrix.  Plain JAX: a Pallas
    launch + (8,128) layout padding costs more than the math; XLA fuses it."""
    logits = logits.astype(jnp.float32)
    lse = jax.nn.logsumexp(logits, axis=-1)
    picked = jnp.take_along_axis(
        logits, labels[:, None].astype(jnp.int32), axis=-1)[:, 0]
    return jnp.mean(lse - picked)


# ----------------------------------------------------------------------------
# CLIP_MultiTaskLoss.forward equivalent
# ----------------------------------------------------------------------------
def clip_multitask_loss(seg_feat, seg_logits, seg_gt, text_embeds,
                        mask_logits=None, mask_labels=None,
                        similarity=None, clip_targets=None,
                        lambda_seg_clip=1.0, lambda_mask=1.0,
                        lambda_clip_roi=1.0, clip_matmul_dtype=None):
    # clip_matmul_dtype: set to jnp.bfloat16 on v5e when f32 operands make the
    # CLIP matmul the binding unit (f32 on the MXU is multi-pass emulation);
    # default None keeps native precision.
    if text_embeds is not None:
        seg_ce_loss, clip_seg_loss = _fused_seg_clip_mean(
            seg_logits, seg_feat, seg_gt, text_embeds,
            mm_dtype=clip_matmul_dtype)
    else:
        seg_ce_loss = _class_major_ce_mean(seg_logits, seg_gt)
        clip_seg_loss = jnp.float32(0.0)

    # mask_loss: CE over the channel dim of RoI mask logits.
    # TODO(synk): the PyTorch list-of-ragged-masks filtering (m.numel() > 0)
    # and torch.cat are Python-level here; we take already-concatenated arrays.
    if (mask_logits is not None and mask_labels is not None
            and mask_labels.size > 0):
        mask_lbl = jnp.squeeze(mask_labels, axis=1).astype(jnp.int32)
        mask_loss = _class_major_ce_mean(mask_logits, mask_lbl)
    else:
        mask_loss = jnp.float32(0.0)

    # clip_roi_loss: CE over the RoI/class similarity matrix (tiny -> plain JAX)
    if similarity is not None and clip_targets is not None:
        clip_roi_loss = _row_ce_mean(similarity, clip_targets)
    else:
        clip_roi_loss = jnp.float32(0.0)

    total_loss = (seg_ce_loss
                  + lambda_seg_clip * clip_seg_loss
                  + lambda_mask * mask_loss
                  + lambda_clip_roi * clip_roi_loss)
    return total_loss, {'seg_ce_loss': seg_ce_loss,
                        'clip_seg_loss': clip_seg_loss,
                        'mask_loss': mask_loss,
                        'clip_roi_loss': clip_roi_loss}


# ----------------------------------------------------------------------------
# Pure-JAX reference (sanity checking only)
# ----------------------------------------------------------------------------
def _ref_ce(logits, labels):
    logits = logits.astype(jnp.float32)
    lse = jax.nn.logsumexp(logits, axis=-1)
    picked = jnp.take_along_axis(
        logits, labels[:, None].astype(jnp.int32), axis=-1)[:, 0]
    return jnp.mean(lse - picked)


def _ref_normalize(x):
    n = jnp.sqrt(jnp.sum(x * x, axis=-1, keepdims=True))
    return x / jnp.maximum(n, 1e-12)


def _ref_seg_clip(seg_feat, seg_logits, seg_gt, text_embeds):
    C = seg_logits.shape[1]
    D = seg_feat.shape[1]
    lg = jnp.transpose(seg_logits, (0, 2, 3, 1)).reshape(-1, C)
    ft = jnp.transpose(seg_feat, (0, 2, 3, 1)).reshape(-1, D)
    gt = seg_gt.reshape(-1)
    seg = _ref_ce(lg, gt)
    clip = _ref_ce(_ref_normalize(ft) @ _ref_normalize(text_embeds).T, gt)
    return seg, clip


if __name__ == "__main__":
    key = jax.random.PRNGKey(0)
    TOL = dict(rtol=2e-5, atol=2e-5)

    # ---- main path: full-extent pixel tile, accumulate over pixel axis ----
    B, C, H, W, D = 2, 4, 8, 8, 32
    Nroi, Kroi = 2, 4
    ks = jax.random.split(key, 8)
    seg_feat = jax.random.normal(ks[0], (B, D, H, W), jnp.float32)      # NCHW
    seg_logits = jax.random.normal(ks[1], (B, C, H, W), jnp.float32)    # NCHW
    seg_gt = jax.random.randint(ks[2], (B, H, W), 0, C, jnp.int32)
    text_embeds = jax.random.normal(ks[3], (C, D), jnp.float32)
    mask_logits = jax.random.normal(ks[4], (Nroi, C, H, W), jnp.float32)
    mask_labels = jax.random.randint(ks[5], (Nroi, 1, H, W), 0, 2).astype(jnp.float32)
    similarity = jax.random.normal(ks[6], (Nroi, Kroi), jnp.float32)
    clip_targets = jax.random.randint(ks[7], (Nroi,), 0, Kroi, jnp.int32)

    total, parts = clip_multitask_loss(
        seg_feat, seg_logits, seg_gt, text_embeds,
        mask_logits=mask_logits, mask_labels=mask_labels,
        similarity=similarity, clip_targets=clip_targets)
    total = jax.block_until_ready(total)

    ref_seg, ref_clip = _ref_seg_clip(seg_feat, seg_logits, seg_gt, text_embeds)
    ref_mask = _ref_ce(
        jnp.transpose(mask_logits, (0, 2, 3, 1)).reshape(-1, C),
        jnp.squeeze(mask_labels, 1).astype(jnp.int32).reshape(-1))
    ref_roi = _ref_ce(similarity, clip_targets)
    ref_total = ref_seg + ref_clip + ref_mask + ref_roi

    np.testing.assert_allclose(np.asarray(total), np.asarray(ref_total), **TOL)
    np.testing.assert_allclose(np.asarray(parts['seg_ce_loss']),
                               np.asarray(ref_seg), **TOL)
    np.testing.assert_allclose(np.asarray(parts['clip_seg_loss']),
                               np.asarray(ref_clip), **TOL)
    np.testing.assert_allclose(np.asarray(parts['mask_loss']),
                               np.asarray(ref_mask), **TOL)
    np.testing.assert_allclose(np.asarray(parts['clip_roi_loss']),
                               np.asarray(ref_roi), **TOL)

    # ---- masked-tail + accumulator path (P % tile != 0, nP > 1, B > 1) ----
    B2, C2, H2, W2, D2 = 2, 5, 12, 12, 16          # P = 144, tile = 128
    ks2 = jax.random.split(jax.random.PRNGKey(1), 4)
    f2 = jax.random.normal(ks2[0], (B2, D2, H2, W2), jnp.float32)
    l2 = jax.random.normal(ks2[1], (B2, C2, H2, W2), jnp.float32)
    g2 = jax.random.randint(ks2[2], (B2, H2, W2), 0, C2, jnp.int32)
    t2 = jax.random.normal(ks2[3], (C2, D2), jnp.float32)
    s2, c2 = _fused_seg_clip_mean(l2, f2, g2, t2, max_pixel_tile=128)
    s2 = jax.block_until_ready(s2)
    rs2, rc2 = _ref_seg_clip(f2, l2, g2, t2)
    np.testing.assert_allclose(np.asarray(s2), np.asarray(rs2), **TOL)
    np.testing.assert_allclose(np.asarray(c2), np.asarray(rc2), **TOL)

    # ---- B == 1 per-tile ('parallel' pixel axis) path with masked tail ----
    s3, c3 = _fused_seg_clip_mean(l2[:1], f2[:1], g2[:1], t2, max_pixel_tile=128)
    s3 = jax.block_until_ready(s3)
    rs3, rc3 = _ref_seg_clip(f2[:1], l2[:1], g2[:1], t2)
    np.testing.assert_allclose(np.asarray(s3), np.asarray(rs3), **TOL)
    np.testing.assert_allclose(np.asarray(c3), np.asarray(rc3), **TOL)

    # ---- class-major CE kernel with masked tail ----
    ml = jax.random.normal(jax.random.PRNGKey(2), (3, C2, H2, W2), jnp.float32)
    mg = jax.random.randint(jax.random.PRNGKey(3), (3, H2, W2), 0, C2, jnp.int32)
    m4 = jax.block_until_ready(_class_major_ce_mean(ml, mg, max_pixel_tile=128))
    rm4 = _ref_ce(jnp.transpose(ml, (0, 2, 3, 1)).reshape(-1, C2), mg.reshape(-1))
    np.testing.assert_allclose(np.asarray(m4), np.asarray(rm4), **TOL)

    print("KERNEL_OK")
</pallas_src>

<mosaic_0001>
module attributes {stable_mosaic.version = 11 : i64} {
  func.func @_fused_seg_clip_kernel(%arg0: i32, %arg1: i32, %arg2: memref<1x4x64xf32, #tpu.memory_space<vmem>>, %arg3: memref<1x32x64xf32, #tpu.memory_space<vmem>>, %arg4: memref<4x32xf32, #tpu.memory_space<vmem>>, %arg5: memref<1x1x64xi32, #tpu.memory_space<vmem>>, %arg6: memref<1x1x1xf32, #tpu.memory_space<vmem>>, %arg7: memref<1x1x1xf32, #tpu.memory_space<vmem>>) attributes {dimension_semantics = [#tpu.dimension_semantics<parallel>, #tpu.dimension_semantics<arbitrary>], iteration_bounds = array<i64: 2, 1>, scalar_prefetch = 0 : i64, scratch_operands = 0 : i64, tpu.core_type = #tpu.core_type<tc>, window_params = [{transform_indices = @transform_0, window_bounds = array<i64: 1, 4, 64>}, {transform_indices = @transform_1, window_bounds = array<i64: 1, 32, 64>}, {pipeline_mode = #tpu.pipeline_mode<synchronous>, transform_indices = @transform_2, window_bounds = array<i64: 4, 32>}, {transform_indices = @transform_3, window_bounds = array<i64: 1, 1, 64>}, {transform_indices = @transform_4, window_bounds = array<i64: 1, 1, 1>}, {transform_indices = @transform_5, window_bounds = array<i64: 1, 1, 1>}]} {
    %c0 = arith.constant 0 : index
    %c0_0 = arith.constant 0 : index
    %c0_1 = arith.constant 0 : index
    %0 = vector.load %arg5[%c0, %c0_0, %c0_1] : memref<1x1x64xi32, #tpu.memory_space<vmem>>, vector<1x1x64xi32>
    %1 = vector.shape_cast %0 : vector<1x1x64xi32> to vector<1x64xi32>
    %c0_2 = arith.constant 0 : index
    %c0_3 = arith.constant 0 : index
    %c0_4 = arith.constant 0 : index
    %2 = vector.load %arg2[%c0_2, %c0_3, %c0_4] : memref<1x4x64xf32, #tpu.memory_space<vmem>>, vector<1x4x64xf32>
    %3 = vector.shape_cast %2 : vector<1x4x64xf32> to vector<4x64xf32>
    %4 = tpu.iota {dimensions = array<i32: 0>} : vector<4x64xi32>
    %5 = vector.broadcast %1 : vector<1x64xi32> to vector<4x64xi32>
    %6 = arith.cmpi eq, %4, %5 : vector<4x64xi32>
    %cst = arith.constant dense<0xFF800000> : vector<64xf32>
    %7 = vector.multi_reduction <maximumf>, %3, %cst [0] : vector<4x64xf32> to vector<64xf32>
    %8 = vector.shape_cast %7 : vector<64xf32> to vector<1x64xf32>
    %9 = vector.broadcast %8 : vector<1x64xf32> to vector<4x64xf32>
    %10 = arith.subf %3, %9 : vector<4x64xf32>
    %11 = math.exp %10 : vector<4x64xf32>
    %cst_5 = arith.constant dense<0.000000e+00> : vector<64xf32>
    %12 = vector.multi_reduction <add>, %11, %cst_5 [0] : vector<4x64xf32> to vector<64xf32>
    %13 = vector.shape_cast %12 : vector<64xf32> to vector<1x64xf32>
    %14 = math.log %13 : vector<1x64xf32>
    %15 = arith.addf %8, %14 : vector<1x64xf32>
    %cst_6 = arith.constant 0.000000e+00 : f32
    %16 = vector.broadcast %cst_6 : f32 to vector<4x64xf32>
    %17 = arith.select %6, %3, %16 : vector<4x64xi1>, vector<4x64xf32>
    %cst_7 = arith.constant dense<0.000000e+00> : vector<64xf32>
    %18 = vector.multi_reduction <add>, %17, %cst_7 [0] : vector<4x64xf32> to vector<64xf32>
    %19 = vector.shape_cast %18 : vector<64xf32> to vector<1x64xf32>
    %20 = arith.subf %15, %19 : vector<1x64xf32>
    %21 = vector.shape_cast %20 : vector<1x64xf32> to vector<1x1x64xf32>
    %cst_8 = arith.constant dense<0.000000e+00> : vector<1xf32>
    %22 = vector.multi_reduction <add>, %21, %cst_8 [1, 2] : vector<1x1x64xf32> to vector<1xf32>
    %23 = vector.shape_cast %22 : vector<1xf32> to vector<1x1x1xf32>
    %24 = vector.extract %23[0, 0, 0] : f32 from vector<1x1x1xf32>
    %c0_9 = arith.constant 0 : index
    %c0_10 = arith.constant 0 : index
    %c0_11 = arith.constant 0 : index
    %25 = vector.load %arg3[%c0_9, %c0_10, %c0_11] : memref<1x32x64xf32, #tpu.memory_space<vmem>>, vector<1x32x64xf32>
    %26 = vector.shape_cast %25 : vector<1x32x64xf32> to vector<32x64xf32>
    %c0_12 = arith.constant 0 : index
    %c0_13 = arith.constant 0 : index
    %27 = vector.load %arg4[%c0_12, %c0_13] : memref<4x32xf32, #tpu.memory_space<vmem>>, vector<4x32xf32>
    %cst_14 = arith.constant dense<0.000000e+00> : vector<4x64xf32>
    %28 = tpu.matmul %27, %26, %cst_14 {dimension_numbers = #tpu.dot_dimension_numbers<[1], [0], [0], [1], [0, 0, 1, 1], [], []>} : vector<4x32xf32>, vector<32x64xf32>, vector<4x64xf32> -> vector<4x64xf32>
    %29 = arith.mulf %26, %26 : vector<32x64xf32>
    %cst_15 = arith.constant dense<0.000000e+00> : vector<64xf32>
    %30 = vector.multi_reduction <add>, %29, %cst_15 [0] : vector<32x64xf32> to vector<64xf32>
    %31 = vector.shape_cast %30 : vector<64xf32> to vector<1x64xf32>
    %cst_16 = arith.constant 1.000000e-24 : f32
    %32 = vector.broadcast %cst_16 : f32 to vector<1x64xf32>
    %33 = arith.maximumf %31, %32 : vector<1x64xf32>
    %34 = math.rsqrt %33 : vector<1x64xf32>
    %35 = vector.broadcast %34 : vector<1x64xf32> to vector<4x64xf32>
    %36 = arith.mulf %28, %35 : vector<4x64xf32>
    %cst_17 = arith.constant dense<0xFF800000> : vector<64xf32>
    %37 = vector.multi_reduction <maximumf>, %36, %cst_17 [0] : vector<4x64xf32> to vector<64xf32>
    %38 = vector.shape_cast %37 : vector<64xf32> to vector<1x64xf32>
    %39 = vector.broadcast %38 : vector<1x64xf32> to vector<4x64xf32>
    %40 = arith.subf %36, %39 : vector<4x64xf32>
    %41 = math.exp %40 : vector<4x64xf32>
    %cst_18 = arith.constant dense<0.000000e+00> : vector<64xf32>
    %42 = vector.multi_reduction <add>, %41, %cst_18 [0] : vector<4x64xf32> to vector<64xf32>
    %43 = vector.shape_cast %42 : vector<64xf32> to vector<1x64xf32>
    %44 = math.log %43 : vector<1x64xf32>
    %45 = arith.addf %38, %44 : vector<1x64xf32>
    %cst_19 = arith.constant 0.000000e+00 : f32
    %46 = vector.broadcast %cst_19 : f32 to vector<4x64xf32>
    %47 = arith.select %6, %36, %46 : vector<4x64xi1>, vector<4x64xf32>
    %cst_20 = arith.constant dense<0.000000e+00> : vector<64xf32>
    %48 = vector.multi_reduction <add>, %47, %cst_20 [0] : vector<4x64xf32> to vector<64xf32>
    %49 = vector.shape_cast %48 : vector<64xf32> to vector<1x64xf32>
    %50 = arith.subf %45, %49 : vector<1x64xf32>
    %51 = vector.shape_cast %50 : vector<1x64xf32> to vector<1x1x64xf32>
    %cst_21 = arith.constant dense<0.000000e+00> : vector<1xf32>
    %52 = vector.multi_reduction <add>, %51, %cst_21 [1, 2] : vector<1x1x64xf32> to vector<1xf32>
    %53 = vector.shape_cast %52 : vector<1xf32> to vector<1x1x1xf32>
    %54 = vector.extract %53[0, 0, 0] : f32 from vector<1x1x1xf32>
    %c0_i32 = arith.constant 0 : i32
    %55 = arith.cmpi eq, %arg1, %c0_i32 : i32
    %56 = arith.extui %55 : i1 to i32
    %c0_i32_22 = arith.constant 0 : i32
    %57 = arith.cmpi ne, %56, %c0_i32_22 : i32
    scf.if %57 {
      %cst_35 = arith.constant 0.000000e+00 : f32
      %66 = vector.broadcast %cst_35 : f32 to vector<1x1x1xf32>
      %c0_36 = arith.constant 0 : index
      %c0_37 = arith.constant 0 : index
      %c0_38 = arith.constant 0 : index
      %67 = vector.load %arg6[%c0_36, %c0_37, %c0_38] : memref<1x1x1xf32, #tpu.memory_space<vmem>>, vector<1x1x1xf32>
      tpu.vector_store %arg6[%c0_36, %c0_37, %c0_38], %66 {strides = array<i32>} : memref<1x1x1xf32, #tpu.memory_space<vmem>>, vector<1x1x1xf32>,
      %cst_39 = arith.constant 0.000000e+00 : f32
      %68 = vector.broadcast %cst_39 : f32 to vector<1x1x1xf32>
      %c0_40 = arith.constant 0 : index
      %c0_41 = arith.constant 0 : index
      %c0_42 = arith.constant 0 : index
      %69 = vector.load %arg7[%c0_40, %c0_41, %c0_42] : memref<1x1x1xf32, #tpu.memory_space<vmem>>, vector<1x1x1xf32>
      tpu.vector_store %arg7[%c0_40, %c0_41, %c0_42], %68 {strides = array<i32>} : memref<1x1x1xf32, #tpu.memory_space<vmem>>, vector<1x1x1xf32>,
    } else {
    }
    %c0_23 = arith.constant 0 : index
    %c0_24 = arith.constant 0 : index
    %c0_25 = arith.constant 0 : index
    %58 = vector.load %arg6[%c0_23, %c0_24, %c0_25] : memref<1x1x1xf32, #tpu.memory_space<vmem>>, vector<1x1x1xf32>
    %59 = vector.broadcast %24 : f32 to vector<1x1x1xf32>
    %60 = arith.addf %58, %59 : vector<1x1x1xf32>
    %c0_26 = arith.constant 0 : index
    %c0_27 = arith.constant 0 : index
    %c0_28 = arith.constant 0 : index
    %61 = vector.load %arg6[%c0_26, %c0_27, %c0_28] : memref<1x1x1xf32, #tpu.memory_space<vmem>>, vector<1x1x1xf32>
    tpu.vector_store %arg6[%c0_26, %c0_27, %c0_28], %60 {strides = array<i32>} : memref<1x1x1xf32, #tpu.memory_space<vmem>>, vector<1x1x1xf32>,
    %c0_29 = arith.constant 0 : index
    %c0_30 = arith.constant 0 : index
    %c0_31 = arith.constant 0 : index
    %62 = vector.load %arg7[%c0_29, %c0_30, %c0_31] : memref<1x1x1xf32, #tpu.memory_space<vmem>>, vector<1x1x1xf32>
    %63 = vector.broadcast %54 : f32 to vector<1x1x1xf32>
    %64 = arith.addf %62, %63 : vector<1x1x1xf32>
    %c0_32 = arith.constant 0 : index
    %c0_33 = arith.constant 0 : index
    %c0_34 = arith.constant 0 : index
    %65 = vector.load %arg7[%c0_32, %c0_33, %c0_34] : memref<1x1x1xf32, #tpu.memory_space<vmem>>, vector<1x1x1xf32>
    tpu.vector_store %arg7[%c0_32, %c0_33, %c0_34], %64 {strides = array<i32>} : memref<1x1x1xf32, #tpu.memory_space<vmem>>, vector<1x1x1xf32>,
    return
  }
  func.func @transform_0(%arg0: i32, %arg1: i32) -> (i32, i32, i32) {
    %c0_i32 = arith.constant 0 : i32
    %c0_i32_0 = arith.constant 0 : i32
    return %arg0, %c0_i32, %arg1 : i32, i32, i32
  }
  func.func @transform_1(%arg0: i32, %arg1: i32) -> (i32, i32, i32) {
    %c0_i32 = arith.constant 0 : i32
    %c0_i32_0 = arith.constant 0 : i32
    return %arg0, %c0_i32, %arg1 : i32, i32, i32
  }
  func.func @transform_2(%arg0: i32, %arg1: i32) -> (i32, i32) {
    %c0_i32 = arith.constant 0 : i32
    %c0_i32_0 = arith.constant 0 : i32
    %c0_i32_1 = arith.constant 0 : i32
    return %c0_i32, %c0_i32_0 : i32, i32
  }
  func.func @transform_3(%arg0: i32, %arg1: i32) -> (i32, i32, i32) {
    %c0_i32 = arith.constant 0 : i32
    %c0_i32_0 = arith.constant 0 : i32
    return %arg0, %c0_i32, %arg1 : i32, i32, i32
  }
  func.func @transform_4(%arg0: i32, %arg1: i32) -> (i32, i32, i32) {
    %c0_i32 = arith.constant 0 : i32
    %c0_i32_0 = arith.constant 0 : i32
    %c0_i32_1 = arith.constant 0 : i32
    return %arg0, %c0_i32, %c0_i32_0 : i32, i32, i32
  }
  func.func @transform_5(%arg0: i32, %arg1: i32) -> (i32, i32, i32) {
    %c0_i32 = arith.constant 0 : i32
    %c0_i32_0 = arith.constant 0 : i32
    %c0_i32_1 = arith.constant 0 : i32
    return %arg0, %c0_i32, %c0_i32_0 : i32, i32, i32
  }
}

</mosaic_0001>

<bundles_post_ra>
// kernel: tpu_custom_call.1
= control target key start
LH: loop header
LB: loop body
LE: loop exit
PB: predicated region body
PF: predicated region fallthrough
CT: control target
= control target key end

     0   :  { %11 = vsyncpa [#allocation3], 0  ;;  %s1144_s0 = inlined_call_operand.hbm [shape: f32[2,4,64], index: 0, kind: input, shape index: {}]   ;;  %s1145_s1 = inlined_call_operand.hbm [shape: f32[2,32,64], index: 1, kind: input, shape index: {}]   ;;  %s1146_s2 = inlined_call_operand.vmem [shape: f32[4,32], index: 2, kind: input, shape index: {}]   ;;  %s1147_s3 = inlined_call_operand.vmem [shape: s32[2,1,64], index: 3, kind: input, shape index: {}]   ;;  %s1148_s4 = inlined_call_operand.vmem [shape: f32[2,1,1], index: 4, kind: output, shape index: {0}]   ;;  %s1149_s5 = inlined_call_operand.vmem [shape: f32[2,1,1], index: 5, kind: output, shape index: {1}]  }
   0x1   :  { %13 = vsyncpa [#allocation3 + $0x1], 0 }
   0x2   :  { %14 = vsyncpa [#allocation5], 0 }
   0x3   :  { %16 = vsyncpa [#allocation5 + $0x1], 0  ;;  %s936_s18 = smov 0   ;;  %s938_s19 = smov 0  }
   0x4   :  { %s940_s20 = smov 0   ;;  %s942_s21 = smov 0  }
   0x5   :  { %s944_s22 = smov 0   ;;  %s946_s23 = smov 0  }
   0x6 LB: > { %s665_s24 = sadd.s32 4294967295, %s897_s23   ;;  %s34_s25 = sadd.s32 1, %s893_s22  ;;  %s897_s23 = sphi %s946_s23, %s22_s23   ;;  %s893_s22 = sphi %s944_s22, %s1162_s22   ;;  %s889_s21 = sphi %s942_s21, %s1161_s21   ;;  %s885_s20 = sphi %s940_s20, %s1160_s20   ;;  %s881_s19 = sphi %s938_s19, %s1159_s19   ;;  %s877_s18 = sphi %s936_s18, %s1158_s18  }
   0x7   : > { %p36_p0 = scmp.ge.s32.totalorder %s34_s25, 2  ;;  %s43_s26 = sadd.s32 1, %s885_s20 }
   0x8   : > { %p50_p1 = scmp.ne.s32.totalorder %s885_s20, %s881_s19  ;;  %p51_p2 = scmp.eq.s32.totalorder %s897_s23, 0 }
   0x9   : > { %s1164_s25 = smov (%p36_p0, %s34_s25), 0  ;;  %p56_p4 = scmp.ne.s32.totalorder %s881_s19, %s877_s18 }
   0xa   : > { %p972_p3 = por %p51_p2, %p50_p1  ;;  %s38_s28 = ssub.s32 %s893_s22, %s1164_s25 }
   0xb   : > { %p57_p5 = scmp.eq.s32.totalorder %s665_s24, 0  ;;  %p41_p6 = scmp.eq.s32.totalorder %s38_s28, 0 }
   0xc   : > { %p719_p8 = scmp.lt.s32.totalorder %s897_s23, 2  ;;  %s988_s6 = sand.u32 1, %s885_s20  }
   0xd   : > { %p979_p7 = por %p57_p5, %p56_p4  ;;  %s670_s7 = sshll.u32 %s893_s22, 6 }
   0xe   : > { %s985_s30 = scalar_select %p41_p6, %s885_s20, %s43_s26  }
   0xf   : > { %s1152_s29 = scalar_select %p979_p7, 1, 0 }
  0x10   : > { %s669_s8 = sshll.u32 %s988_s6, 2  ;;  %s995_s11 = scalar_lea.hbm %s1144_s0, %s670_s7 }
  0x11   : > { %s216_s12 = scalar_lea.vmem [#allocation2], %s669_s8  ;;  %p999_p9 = pnand %p719_p8, %p972_p3 }
  0x12   : > { %s224_s13 = sshll.u32 %s216_s12, 4  ;;  %s213_s15 = scalar_lea.sflag [#allocation3], %s988_s6  ;;  %s1003_s13 = int_to_ptr.vmem [resolvable:$true] %s224_s13 }
  0x13   : > { %s783_s16 = scalar_lea.hbm %s995_s11, 64  ;;  %p785_p13 = pneg %p999_p9 }
  0x14   : > { %p784_p12 = scmp.ne.s32.totalorder %s995_s11, %s783_s16  ;;  %s788_s24 = scalar_lea.hbm %s1144_s0, 128 }
  0x15   : > { %p789_p2 = scmp.lt.u32.totalorder %s995_s11, %s1144_s0  ;;  %p790_p3 = scmp.lt.u32.totalorder %s788_s24, %s783_s16 }
  0x16   : > { %p786_p0 = pnand %p785_p13, %p784_p12  ;;  %p792_p5 = scmp.lt.u32.totalorder %s783_s16, %s995_s11 }
  0x17   : > { %p791_p4 = por %p790_p3, %p789_p2 }
  0x18   : > { %p787_p1 = pneg %p786_p0 }
  0x19   : > { %p793_p6 = por %p792_p5, %p791_p4 }
  0x1b   : > { %p794_p8 = pnand %p793_p6, %p787_p1 }
  0x1d   : > { %797 = shalt.err (!%p794_p8)
}
  0x1e   : > { %s798_s28 = scalar_lea.vmem %s1003_s13, 64  ;;  %s899_s7 = smov [#allocation2]  }
  0x1f   : > { %p799_p12 = scmp.ne.s32.totalorder %s1003_s13, %s798_s28  ;;  %s803_s8 = sshll.u32 %s899_s7, 4  ;;  %s804_s8 = int_to_ptr.vmem [resolvable:$false] %s803_s8 }
  0x20   : > { %s805_s9 = scalar_lea.vmem %s804_s8, 128  ;;  %p806_p11 = scmp.lt.s32.totalorder %s1003_s13, %s804_s8 }
  0x21   : > { %p801_p0 = pnand %p799_p12, %p785_p13  ;;  %p807_p2 = scmp.lt.s32.totalorder %s805_s9, %s798_s28 }
  0x23   : > { %p802_p10 = pneg %p801_p0  ;;  %p808_p3 = por %p807_p2, %p806_p11 }
  0x25   : > { %p809_p4 = pnand %p808_p3, %p802_p10 }
  0x27   : > { %812 = shalt.err (!%p809_p4)
}
  0x28   : > { %715 = dma.hbm_to_vmem [thread:$0]  (!%p999_p9), %s995_s11, 64, %s1003_s13, %s213_s15  }
  0x29   : > { %p1154_p1 = scmp.lt.s32.totalorder %s897_s23, 3  ;;  %p1155_p5 = scmp.ge.s32.totalorder %s897_s23, 1 }
  0x2a   : > { %s671_s12 = sshll.u32 %s988_s6, 5  ;;  %s681_s16 = sshll.u32 %s893_s22, 9 }
  0x2b   : > { %p1037_p6 = pnand %p1155_p5, %p1154_p1  ;;  %s1046_s24 = scalar_lea.hbm %s1145_s1, %s681_s16 }
  0x2c   : > { %s235_s26 = scalar_lea.vmem [#allocation4], %s671_s12  ;;  %s232_s11 = scalar_lea.sflag [#allocation5], %s988_s6 }
  0x2d   : > { %s243_s27 = sshll.u32 %s235_s26, 4  ;;  %s813_s13 = scalar_lea.hbm %s1046_s24, 512  ;;  %s1048_s27 = int_to_ptr.vmem [resolvable:$true] %s243_s27 }
  0x2e   : > { %p814_p10 = scmp.ne.s32.totalorder %s1046_s24, %s813_s13  ;;  %s818_s7 = scalar_lea.hbm %s1145_s1, 1024 }
  0x2f   : > { %p819_p12 = scmp.lt.u32.totalorder %s1046_s24, %s1145_s1  ;;  %p820_p0 = scmp.lt.u32.totalorder %s818_s7, %s813_s13 }
  0x30   : > { %p816_p11 = pnand %p814_p10, %p785_p13  ;;  %p822_p3 = scmp.lt.u32.totalorder %s813_s13, %s1046_s24 }
  0x31   : > { %p821_p2 = por %p820_p0, %p819_p12 }
  0x32   : > { %p817_p8 = pneg %p816_p11 }
  0x33   : > { %p823_p4 = por %p822_p3, %p821_p2 }
  0x35   : > { %p824_p1 = pnand %p823_p4, %p817_p8 }
  0x37   : > { %827 = shalt.err (!%p824_p1)
}
  0x38   : > { %s828_s12 = scalar_lea.vmem %s1048_s27, 512  ;;  %s900_s16 = smov [#allocation4]  }
  0x39   : > { %p829_p5 = scmp.ne.s32.totalorder %s1048_s27, %s828_s12  ;;  %s833_s17 = sshll.u32 %s900_s16, 4  ;;  %s834_s17 = int_to_ptr.vmem [resolvable:$false] %s833_s17 }
  0x3a   : > { %s835_s18 = scalar_lea.vmem %s834_s17, 1024  ;;  %p836_p7 = scmp.lt.s32.totalorder %s1048_s27, %s834_s17 }
  0x3b   : > { %p831_p10 = pnand %p829_p5, %p785_p13  ;;  %p837_p12 = scmp.lt.s32.totalorder %s835_s18, %s828_s12 }
  0x3d   : > { %p832_p11 = pneg %p831_p10  ;;  %p838_p0 = por %p837_p12, %p836_p7 }
  0x3f   : > { %p839_p2 = pnand %p838_p0, %p832_p11 }
  0x41   : > { %842 = shalt.err (!%p839_p2)
}
  0x42   : > { %s901_s26 = smov 128   ;;  %s902_s13 = smov 8  }
  0x43   : > { %718 = dma.hbm_to_vmem [thread:$0]  (!%p999_p9), %s1046_s24, 512, %s1048_s27, %s232_s11, %s901_s26, %s901_s26, %s902_s13  }
  0x44   : > { %264 = sbr.rel (%p1037_p6) target bundleno = 570 (0x23a), region = 36  ;;  %s266_s15 = sand.u32 (!%p1037_p6), 1, %s881_s19  }
  0x45   : > { %s675_s28 = sshll.u32 (!%p1037_p6), %s266_s15, 2  ;;  %s267_s7 = scalar_lea.sflag (!%p1037_p6), [#allocation3], %s266_s15 }
  0x46   : > { %s1079_s8 = scalar_lea.vmem (!%p1037_p6), [#allocation2], %s675_s28  ;;  %p1157_p7 = scmp.ne.s32.totalorder (!%p1037_p6), %s1152_s29, 0 }
  0x4b   : > { %868 = dma.done.wait (%p1157_p7), %s267_s7, 64  }
  0x4c   : > { %870 = vsyncadd (%p1157_p7), %s267_s7, 4294967232  ;;  %s676_s9 = sshll.u32 %s266_s15, 5  ;;  %s276_s14 = scalar_lea.sflag [#allocation5], %s266_s15 }
  0x4d   : > { %s279_s6 = scalar_lea.vmem [#allocation4], %s676_s9 }
  0x4e   : > { %872 = dma.done.wait (%p1157_p7), %s276_s14, 512  }
  0x4f   : > { %874 = vsyncadd (%p1157_p7), %s276_s14, 4294966784  ;;  %v903_v0 = vmov 0.0|0.0   ;;  %vm904_vm0 = vmmov 0   ;;  %v905_v1 = vmov 0.0   ;;  %v380_v2 = vld [vmem:[%s279_s6] sm:$0xff]  ;;  %v381_v3 = vld [vmem:[%s279_s6 + $0x8] sm:$0xff]  ;;  %v332_v30 = vlaneseq }
  0x50   : > { %698 = vmatprep.subr.bf16.mxu0 %v903_v0  ;;  %695 = vmatprep.mubr.msk.f32.mxu0 %vm904_vm0, %v905_v1  ;;  %vm463_vm1 = vcmask 523264   ;;  %v382_v4 = vld [vmem:[%s279_s6 + $0x10] sm:$0xff]  ;;  %v699_v5 = vpack.c.bf16 %v381_v3, %v380_v2  ;;  %v459_v6 = vmul.f32 %v380_v2, %v380_v2  ;;  %v460_v7 = vmul.f32 %v381_v3, %v381_v3  ;;  %v383_v8 = vld [vmem:[%s279_s6 + $0x18] sm:$0xff]  ;;  %p318_p9 = scmp.lt.s32.totalorder %s889_s21, 1 }
  0x51   : > { %v461_v9 = vmul.f32 %v382_v4, %v382_v4  ;;  %v462_v10 = vmul.f32 %v383_v8, %v383_v8  ;;  %v702_v13 = vpack.c.bf16 %v383_v8, %v382_v4  ;;  %v384_v18 = vld [vmem:[%s1146_s2] sm:$0xf]  ;;  %vm385_vm2 = vcmask 261120  }
  0x52   : > { %700 = vmatpush3.bf16.msra.mxu0 %v699_v5  ;;  %v464_v11 = vsel %vm463_vm1, %v459_v6, 0.0  ;;  %v465_v12 = vsel %vm463_vm1, %v460_v7, 0.0  ;;  %v331_v20 = vld [vmem:[%s1079_s8] sm:$0xf]  ;;  %vm339_vm3 = vcmask 519168   ;;  %s1166_s21 = smov (!%p318_p9, %s889_s21), 1 }
  0x53   : > { %v467_v14 = vsel %vm463_vm1, %v461_v9, 0.0  ;;  %v466_v15 = vadd.f32 %v465_v12, %v464_v11  ;;  %701 = vmatprep.subr.bf16.mxu0 %v903_v0  ;;  %v469_v16 = vsel %vm463_vm1, %v462_v10, 0.0  ;;  %v340_v21 = vsel %vm339_vm3, %v331_v20, -inf  ;;  %s323_s11 = scalar_lea.vmem %s1147_s3, %s1166_s21  ;;  %s326_s17 = scalar_lea.vmem %s1148_s4, %s1166_s21 }
  0x54   : > { %v341_v22 = vrot.slane %v340_v21, 4  ;;  %v333_v31 = vshrl.u32 %v332_v30, 7  ;;  %v677_v32 = vld [vmem:[%s323_s11] ss:$0 sm:$0xff]  ;;  %vm369_vm5 = vcmask 516096   ;;  %vm523_vm6 = vcmask 0   ;;  %s329_s13 = scalar_lea.vmem %s1149_s5, %s1166_s21 }
  0x55   : > { %v468_v17 = vadd.f32 %v467_v14, %v466_v15  ;;  %524 = vst.msk [vmem:[%s326_s17] sm:$0x1] %vm523_vm6, %v905_v1  ;;  %525 = vst.msk [vmem:[%s329_s13] sm:$0x1] %vm523_vm6, %v905_v1 }
  0x56   : > { %703 = vmatpush3.bf16.msra.mxu0 %v702_v13  ;;  %v342_v23 = vmax.f32 %v340_v21, %v341_v22  ;;  %vm338_vm4 = vcmp.eq.s32.totalorder %v333_v31, %v677_v32 }
  0x57   : > { %v470_v19 = vadd.f32 %v469_v16, %v468_v17  ;;  %v360_v33 = vsel %vm338_vm4, %v331_v20, 0.0 }
  0x58   : > { %v343_v24 = vrot.slane %v342_v23, 2  ;;  %v361_v36 = vsel %vm339_vm3, %v360_v33, 0.0 }
  0x59   : > { %696 = vmatmul.mubr.msk.f32.vlgmr.msra.gmra.mrb[0].mxu0 %vm385_vm2, %v384_v18  ;;  %v362_v39 = vrot.slane %v361_v36, 4  ;;  %v471_v54 = vrot.slane %v470_v19, 4 }
  0x5a   : > { %v344_v25 = vmax.f32 %v342_v23, %v343_v24 }
  0x5b   : > { %v363_v42 = vadd.f32 %v362_v39, %v361_v36  ;;  %v472_v55 = vadd.f32 %v471_v54, %v470_v19 }
  0x5c   : > { %v345_v26 = vrot.slane %v344_v25, 1  ;;  %v526_v39 = vld [vmem:[%s326_s17] sm:$0x1] }
  0x5d   : > { %v364_v45 = vrot.slane %v363_v42, 2  ;;  %v473_v56 = vrot.slane %v472_v55, 2 }
  0x5e   : > { %v346_v27 = vmax.f32 %v344_v25, %v345_v26 }
  0x5f   : > { %v365_v46 = vadd.f32 %v364_v45, %v363_v42  ;;  %v474_v57 = vadd.f32 %v473_v56, %v472_v55 }
  0x60   : > { %v347_v28 = vsub.f32 %v331_v20, %v346_v27 }
  0x61   : > { %v366_v47 = vrot.slane %v365_v46, 1  ;;  %v475_v58 = vrot.slane %v474_v57, 1 }
  0x62   : > { %v348_v29 = vmul.f32 1.442695, %v347_v28 }
  0x63   : > { %v367_v50 = vadd.f32 %v366_v47, %v365_v46  ;;  %v476_v59 = vadd.f32 %v475_v58, %v474_v57 }
  0x64   : > { %773 = vpow2.f32 %v348_v29 }
  0x65   : > { %v477_v60 = vmax.f32 %v476_v59, 1e-24 }
  0x6e   : > { %v774_v34 = vpop.eup %773 }
  0x6f   : > { %v350_v35 = vsel %vm339_vm3, %v774_v34, 0.0 }
  0x70   : > { %v351_v37 = vrot.slane %v350_v35, 4 }
  0x72   : > { %v352_v38 = vadd.f32 %v351_v37, %v350_v35 }
  0x74   : > { %v353_v40 = vrot.slane %v352_v38, 2 }
  0x76   : > { %v354_v41 = vadd.f32 %v353_v40, %v352_v38 }
  0x78   : > { %v355_v43 = vrot.slane %v354_v41, 1 }
  0x7a   : > { %v356_v44 = vadd.f32 %v355_v43, %v354_v41 }
  0x7c   : > { %775 = vlog2.f32 %v356_v44 }
  0x7d   : > { %777 = vrsqrt.f32 %v477_v60 }
  0x86   : > { %v776_v48 = vpop.eup %775 }
  0x87   : > { %v358_v49 = vmul.f32 0.6931472, %v776_v48  ;;  %v778_v61 = vpop.eup %777 }
  0x89   : > { %v359_v51 = vadd.f32 %v358_v49, %v346_v27  ;;  %v531_v49 = vld [vmem:[%s329_s13] sm:$0x1] }
  0x8b   : > { %v368_v52 = vsub.f32 %v359_v51, %v367_v50 }
  0x8d   : > { %v370_v53 = vsel %vm369_vm5, %v368_v52, 0.0 }
  0x8e   : > { %371 = vadd.xlane.f32.xlu0 %v370_v53 }
 0x11b   : > { %v372_v32 = vpop.xlane.xlu0 %371 }
 0x11c   : > { %v373_v33 = vrot.slane %v372_v32, 4 }
 0x11e   : > { %v374_v34 = vadd.f32 %v373_v33, %v372_v32 }
 0x120   : > { %v375_v35 = vrot.slane %v374_v34, 2 }
 0x122   : > { %v376_v36 = vadd.f32 %v375_v35, %v374_v34 }
 0x124   : > { %v377_v37 = vrot.slane %v376_v36, 1 }
 0x126   : > { %v378_v38 = vadd.f32 %v377_v37, %v376_v36 }
 0x128   : > { %704 = vpush %v378_v38 }
 0x12c   : > { %v455_v62 = vpop.f32.mrb[0].mxu0 }
 0x12d   : > { %v479_v63 = vmul.f32 %v778_v61, %v455_v62  ;;  %v697_v0 = vpop.f32.mrb[1].mxu0 }
 0x12f   : > { %v480_v2 = vsel %vm339_vm3, %v479_v63, -inf  ;;  %v500_v12 = vsel %vm338_vm4, %v479_v63, 0.0 }
 0x130   : > { %v481_v3 = vrot.slane %v480_v2, 4  ;;  %v501_v15 = vsel %vm339_vm3, %v500_v12, 0.0 }
 0x131   : > { %v502_v18 = vrot.slane %v501_v15, 4 }
 0x132   : > { %v482_v4 = vmax.f32 %v480_v2, %v481_v3 }
 0x133   : > { %v503_v21 = vadd.f32 %v502_v18, %v501_v15 }
 0x134   : > { %v483_v5 = vrot.slane %v482_v4, 2 }
 0x135   : > { %v504_v23 = vrot.slane %v503_v21, 2 }
 0x136   : > { %v484_v6 = vmax.f32 %v482_v4, %v483_v5 }
 0x137   : > { %v505_v24 = vadd.f32 %v504_v23, %v503_v21 }
 0x138   : > { %v485_v7 = vrot.slane %v484_v6, 1 }
 0x139   : > { %v506_v25 = vrot.slane %v505_v24, 1 }
 0x13a   : > { %v486_v8 = vmax.f32 %v484_v6, %v485_v7 }
 0x13b   : > { %v507_v29 = vadd.f32 %v506_v25, %v505_v24 }
 0x13c   : > { %v487_v9 = vsub.f32 %v479_v63, %v486_v8 }
 0x13e   : > { %v488_v10 = vmul.f32 1.442695, %v487_v9 }
 0x140   : > { %779 = vpow2.f32 %v488_v10 }
 0x14a   : > { %v780_v11 = vpop.eup %779 }
 0x14b   : > { %v490_v13 = vsel %vm339_vm3, %v780_v11, 0.0 }
 0x14c   : > { %v491_v14 = vrot.slane %v490_v13, 4 }
 0x14e   : > { %v492_v16 = vadd.f32 %v491_v14, %v490_v13 }
 0x150   : > { %v493_v17 = vrot.slane %v492_v16, 2 }
 0x152   : > { %v494_v19 = vadd.f32 %v493_v17, %v492_v16 }
 0x154   : > { %v495_v20 = vrot.slane %v494_v19, 1 }
 0x156   : > { %v496_v22 = vadd.f32 %v495_v20, %v494_v19 }
 0x158   : > { %781 = vlog2.f32 %v496_v22 }
 0x159   : > { %s705_s15 = spop %704 }
 0x15a   : > { %v527_v40 = vstv %s705_s15 }
 0x15b   : > { %v528_v41 = vadd.f32 %v527_v40, %v526_v39 }
 0x15d   : > { %530 = vst.msk [vmem:[%s326_s17] sm:$0x1] %vm523_vm6, %v528_v41 }
 0x162   : > { %v782_v26 = vpop.eup %781 }
 0x163   : > { %v498_v27 = vmul.f32 0.6931472, %v782_v26 }
 0x165   : > { %v499_v28 = vadd.f32 %v498_v27, %v486_v8 }
 0x167   : > { %v508_v30 = vsub.f32 %v499_v28, %v507_v29 }
 0x169   : > { %v509_v31 = vsel %vm369_vm5, %v508_v30, 0.0 }
 0x16a   : > { %510 = vadd.xlane.f32.xlu0 %v509_v31 }
 0x1f7   : > { %v511_v42 = vpop.xlane.xlu0 %510 }
 0x1f8   : > { %v512_v43 = vrot.slane %v511_v42, 4 }
 0x1fa   : > { %v513_v44 = vadd.f32 %v512_v43, %v511_v42 }
 0x1fc   : > { %v514_v45 = vrot.slane %v513_v44, 2 }
 0x1fe   : > { %v515_v46 = vadd.f32 %v514_v45, %v513_v44 }
 0x200   : > { %v516_v47 = vrot.slane %v515_v46, 1 }
 0x202   : > { %v517_v48 = vadd.f32 %v516_v47, %v515_v46 }
 0x204   : > { %706 = vpush %v517_v48 }
 0x235   : > { %s707_s21 = spop %706 }
 0x236   : > { %v532_v50 = vstv %s707_s21 }
 0x237   : > { %v533_v51 = vadd.f32 %v532_v50, %v531_v49 }
 0x239   : > { %534 = vst.msk [vmem:[%s329_s13] sm:$0x1] %vm523_vm6, %v533_v51 }
 0x23a PF: > { %s22_s23 = sadd.s32 1, %s897_s23   ;;  %s1158_s18 = smov %s881_s19 }
 0x23b   : > { %p19_p13 = scmp.ge.s32.totalorder %s22_s23, 4   ;;  %s1159_s19 = smov %s885_s20 }
 0x23c   : > { %s1160_s20 = smov %s985_s30  ;;  %s1161_s21 = smov %s893_s22 }
 0x23d   : > { %s1162_s22 = smov %s1164_s25  ;;  %21 = sbr.rel (!%p19_p13) target bundleno = 6 (0x6), region = 108 }
 0x244   :  { %564 = vsyncpa [#allocation3], 1 }
 0x245   :  { %566 = vsyncpa [#allocation3 + $0x1], 1 }
 0x246   :  { %567 = vsyncpa [#allocation5], 1 }
 0x247   :  { %569 = vsyncpa [#allocation5 + $0x1], 1 }

</bundles_post_ra>
